<compile_context>
chip_gen: v6e
topology: v6e:2x2x1
jax: 0.10.0
libtpu: 0.0.40
codegen_flags: <defaults>
</compile_context>

<pallas_src>
import functools

import jax
import jax.numpy as jnp
from jax.experimental import pallas as pl
from jax.experimental.pallas import tpu as pltpu

_MEGACORE_MIN_ROWS = 256   # force >=2 grid tiles once the batch is at least 2x this
_MAX_BLOCK_BATCH = 4096    # keeps the tile comfortably inside v7x's 64 MiB VMEM


def _round_up(n, m):
    return (n + m - 1) // m * m


def _pad_to(a, shape):
    pads = [(0, s - d) for d, s in zip(a.shape, shape)]
    return jnp.pad(a, pads)


def dqn_kernel(x_ref, wpk_ref, w3_ref, bpk_ref, o_ref):
    # Static padded widths from the (trace-time) ref shapes.
    hp = wpk_ref.shape[1]               # padded hidden width (multiple of 128)
    isp = wpk_ref.shape[0] - hp         # padded input width (sublane aligned)
    op = w3_ref.shape[1]                # padded output width (small, e.g. 8)

    # Static sublane-aligned views into the packed weight / bias operands (free).
    w1 = wpk_ref[0:isp, :]
    w2 = wpk_ref[isp:isp + hp, :]
    b1 = bpk_ref[0:1, :hp]
    b2 = bpk_ref[1:2, :hp]
    b3 = bpk_ref[2:3, :op]

    x = x_ref[...]

    # fc1 + ReLU   (low-precision inputs, f32 accumulation)
    h1 = jnp.dot(x, w1, preferred_element_type=jnp.float32)
    h1 = jnp.maximum(h1 + b1, 0.0)
    # fc2 + ReLU
    h2 = jnp.dot(h1.astype(w2.dtype), w2, preferred_element_type=jnp.float32)
    h2 = jnp.maximum(h2 + b2, 0.0)
    # fc3 (no activation), lane-narrow (op wide) store
    out = jnp.dot(h2.astype(w3_ref.dtype), w3_ref[...],
                  preferred_element_type=jnp.float32)
    o_ref[...] = (out + b3).astype(o_ref.dtype)


def pack_dqn_params(params, compute_dtype=jnp.bfloat16):
    """Pad + pack the parameters ONCE (call outside the training/eval loop).

    Returns (wpk, w3p, bpk):
      wpk: [isp + hp, hp] compute_dtype   -- w1 (rows 0:isp) and w2 (rows isp:) packed
      w3p: [hp, op]       compute_dtype   -- output projection, op padded only to 8
      bpk: [8, bcols]     float32         -- rows 0/1/2 = b1/b2/b3 (f32 for precision)
    """
    w1, b1 = params["w1"], params["b1"]
    w2, b2 = params["w2"], params["b2"]
    w3, b3 = params["w3"], params["b3"]
    input_size, hidden_size = w1.shape
    output_size = w3.shape[1]

    sub = 16 if compute_dtype == jnp.bfloat16 else 8   # bf16 packs 2 rows / sublane
    isp = _round_up(input_size, sub)
    hp = _round_up(hidden_size, 128)                    # lane-dense hidden width
    op = _round_up(output_size, 8)                      # keep output pad SMALL (8, not 128)
    bcols = max(hp, 128, op)

    w1p = _pad_to(w1, (isp, hp)).astype(compute_dtype)
    w2p = _pad_to(w2, (hp, hp)).astype(compute_dtype)
    wpk = jnp.concatenate([w1p, w2p], axis=0)           # (isp + hp, hp)
    w3p = _pad_to(w3, (hp, op)).astype(compute_dtype)   # (hp, op)

    bpk = jnp.concatenate(
        [_pad_to(b1.astype(jnp.float32), (1, bcols)),
         _pad_to(b2.astype(jnp.float32), (1, bcols)),
         _pad_to(b3.astype(jnp.float32), (1, bcols)),
         jnp.zeros((5, bcols), jnp.float32)],           # pad rows -> sublane multiple of 8
        axis=0)                                         # (8, bcols)
    return wpk, w3p, bpk


@functools.partial(jax.jit, static_argnames=("output_size", "block_batch"))
def dqn_forward(x, wpk, w3p, bpk, *, output_size, block_batch=1024):
    """x: [B, input_size] float32; (wpk, w3p, bpk) from pack_dqn_params."""
    batch, in_features = x.shape
    hp = wpk.shape[1]
    isp = wpk.shape[0] - hp
    op = w3p.shape[1]
    assert in_features <= isp and output_size <= op

    compute_dtype = wpk.dtype
    granule = 16 if compute_dtype == jnp.bfloat16 else 8

    # ---- batch tiling: minimal padding + megacore-friendly grid -----------------
    block_batch = max(granule, min(block_batch, _MAX_BLOCK_BATCH))
    batch_g = _round_up(batch, granule)
    n_tiles = pl.cdiv(batch_g, block_batch)
    if n_tiles == 1 and batch_g >= 2 * _MEGACORE_MIN_ROWS:
        n_tiles = 2                      # let ("parallel",) shard across both v7x TCs
    tm = _round_up(pl.cdiv(batch_g, n_tiles), granule)
    padded_batch = n_tiles * tm

    xp = x.astype(compute_dtype)
    if padded_batch != batch or isp != in_features:
        xp = jnp.pad(xp, ((0, padded_batch - batch), (0, isp - in_features)))

    out_padded = pl.pallas_call(
        dqn_kernel,
        out_shape=jax.ShapeDtypeStruct((padded_batch, op), jnp.float32),
        grid=(n_tiles,),
        in_specs=[
            pl.BlockSpec((tm, isp), lambda i: (i, 0)),        # x tile (pipelined)
            pl.BlockSpec((isp + hp, hp), lambda i: (0, 0)),   # packed w1+w2 (resident)
            pl.BlockSpec((hp, op), lambda i: (0, 0)),         # w3 (resident)
            pl.BlockSpec(bpk.shape, lambda i: (0, 0)),        # packed f32 biases (resident)
        ],
        out_specs=pl.BlockSpec((tm, op), lambda i: (i, 0)),
        compiler_params=pltpu.CompilerParams(
            dimension_semantics=("parallel",),
            # above v5e's 16 MiB / v6e-v7x's 32 MiB defaults, under v7x's 64 MiB physical
            vmem_limit_bytes=48 * 1024 * 1024,
        ),
    )(xp, wpk, w3p, bpk)

    # Slice away batch padding and the (8-lane) padded output columns.
    return out_padded[:batch, :output_size]


def init_dqn_params(key, input_size, hidden_size, output_size):
    """Deterministic init mimicking nn.Linear's uniform(-1/sqrt(fan_in), 1/sqrt(fan_in))."""
    keys = jax.random.split(key, 6)

    def linear_init(kw, kb, fan_in, fan_out):
        bound = 1.0 / jnp.sqrt(jnp.float32(fan_in))
        # Stored as [fan_in, fan_out] (transpose of PyTorch's [out, in]).
        w = jax.random.uniform(kw, (fan_in, fan_out), jnp.float32, -bound, bound)
        b = jax.random.uniform(kb, (1, fan_out), jnp.float32, -bound, bound)
        return w, b

    w1, b1 = linear_init(keys[0], keys[1], input_size, hidden_size)
    w2, b2 = linear_init(keys[2], keys[3], hidden_size, hidden_size)
    w3, b3 = linear_init(keys[4], keys[5], hidden_size, output_size)
    return {"w1": w1, "b1": b1, "w2": w2, "b2": b2, "w3": w3, "b3": b3}


def dqn_reference(x, params):
    """Pure-JAX f32 reference for correctness check."""
    h1 = jnp.maximum(x @ params["w1"] + params["b1"], 0.0)
    h2 = jnp.maximum(h1 @ params["w2"] + params["b2"], 0.0)
    return h2 @ params["w3"] + params["b3"]


if __name__ == "__main__":
    input_size, hidden_size, output_size = 16, 32, 4
    batch = 8

    key = jax.random.PRNGKey(0)
    k_params, k_x = jax.random.split(key)

    params = init_dqn_params(k_params, input_size, hidden_size, output_size)
    x = jax.random.normal(k_x, (batch, input_size), jnp.float32)
    ref = dqn_reference(x, params)

    # Strict check of the kernel math on the f32 path.
    packed_f32 = pack_dqn_params(params, jnp.float32)
    out_f32 = jax.block_until_ready(
        dqn_forward(x, *packed_f32, output_size=output_size))
    assert out_f32.shape == (batch, output_size), out_f32.shape
    assert jnp.allclose(out_f32, ref, atol=1e-5, rtol=1e-5), "f32 Pallas output mismatch"

    # Default fast path: bf16 inputs/weights, f32 accumulation (looser tolerance).
    packed_bf16 = pack_dqn_params(params, jnp.bfloat16)
    out_bf16 = jax.block_until_ready(
        dqn_forward(x, *packed_bf16, output_size=output_size))
    assert out_bf16.shape == (batch, output_size), out_bf16.shape
    assert jnp.allclose(out_bf16, ref, atol=5e-2, rtol=5e-2), "bf16 Pallas output mismatch"

    print("KERNEL_OK")
</pallas_src>

<mosaic_0001>
module attributes {stable_mosaic.version = 11 : i64} {
  func.func @dqn_kernel(%arg0: i32, %arg1: memref<8x16xf32, #tpu.memory_space<vmem>>, %arg2: memref<144x128xf32, #tpu.memory_space<vmem>>, %arg3: memref<128x8xf32, #tpu.memory_space<vmem>>, %arg4: memref<8x128xf32, #tpu.memory_space<vmem>>, %arg5: memref<8x8xf32, #tpu.memory_space<vmem>>) attributes {dimension_semantics = [#tpu.dimension_semantics<parallel>], iteration_bounds = array<i64: 1>, scalar_prefetch = 0 : i64, scratch_operands = 0 : i64, tpu.core_type = #tpu.core_type<tc>, window_params = [{transform_indices = @transform_0, window_bounds = array<i64: 8, 16>}, {pipeline_mode = #tpu.pipeline_mode<synchronous>, transform_indices = @transform_1, window_bounds = array<i64: 144, 128>}, {pipeline_mode = #tpu.pipeline_mode<synchronous>, transform_indices = @transform_2, window_bounds = array<i64: 128, 8>}, {pipeline_mode = #tpu.pipeline_mode<synchronous>, transform_indices = @transform_3, window_bounds = array<i64: 8, 128>}, {transform_indices = @transform_4, window_bounds = array<i64: 8, 8>}]} {
    %c0 = arith.constant 0 : index
    %c0_0 = arith.constant 0 : index
    %0 = vector.load %arg2[%c0, %c0_0] : memref<144x128xf32, #tpu.memory_space<vmem>>, vector<16x128xf32>
    %c16 = arith.constant 16 : index
    %c0_1 = arith.constant 0 : index
    %1 = vector.load %arg2[%c16, %c0_1] : memref<144x128xf32, #tpu.memory_space<vmem>>, vector<128x128xf32>
    %c0_2 = arith.constant 0 : index
    %c0_3 = arith.constant 0 : index
    %2 = vector.load %arg4[%c0_2, %c0_3] : memref<8x128xf32, #tpu.memory_space<vmem>>, vector<1x128xf32>
    %c1 = arith.constant 1 : index
    %c0_4 = arith.constant 0 : index
    %3 = vector.load %arg4[%c1, %c0_4] : memref<8x128xf32, #tpu.memory_space<vmem>>, vector<1x128xf32>
    %c2 = arith.constant 2 : index
    %c0_5 = arith.constant 0 : index
    %4 = vector.load %arg4[%c2, %c0_5] : memref<8x128xf32, #tpu.memory_space<vmem>>, vector<1x8xf32>
    %c0_6 = arith.constant 0 : index
    %c0_7 = arith.constant 0 : index
    %5 = vector.load %arg1[%c0_6, %c0_7] : memref<8x16xf32, #tpu.memory_space<vmem>>, vector<8x16xf32>
    %cst = arith.constant dense<0.000000e+00> : vector<8x128xf32>
    %6 = tpu.matmul %5, %0, %cst {dimension_numbers = #tpu.dot_dimension_numbers<[1], [0], [0], [1], [0, 0, 1, 1], [], []>} : vector<8x16xf32>, vector<16x128xf32>, vector<8x128xf32> -> vector<8x128xf32>
    %7 = vector.broadcast %2 : vector<1x128xf32> to vector<8x128xf32>
    %8 = arith.addf %6, %7 : vector<8x128xf32>
    %cst_8 = arith.constant 0.000000e+00 : f32
    %9 = vector.broadcast %cst_8 : f32 to vector<8x128xf32>
    %10 = arith.maximumf %8, %9 : vector<8x128xf32>
    %cst_9 = arith.constant dense<0.000000e+00> : vector<8x128xf32>
    %11 = tpu.matmul %10, %1, %cst_9 {dimension_numbers = #tpu.dot_dimension_numbers<[1], [0], [0], [1], [0, 0, 1, 1], [], []>} : vector<8x128xf32>, vector<128x128xf32>, vector<8x128xf32> -> vector<8x128xf32>
    %12 = vector.broadcast %3 : vector<1x128xf32> to vector<8x128xf32>
    %13 = arith.addf %11, %12 : vector<8x128xf32>
    %cst_10 = arith.constant 0.000000e+00 : f32
    %14 = vector.broadcast %cst_10 : f32 to vector<8x128xf32>
    %15 = arith.maximumf %13, %14 : vector<8x128xf32>
    %c0_11 = arith.constant 0 : index
    %c0_12 = arith.constant 0 : index
    %16 = vector.load %arg3[%c0_11, %c0_12] : memref<128x8xf32, #tpu.memory_space<vmem>>, vector<128x8xf32>
    %cst_13 = arith.constant dense<0.000000e+00> : vector<8x8xf32>
    %17 = tpu.matmul %15, %16, %cst_13 {dimension_numbers = #tpu.dot_dimension_numbers<[1], [0], [0], [1], [0, 0, 1, 1], [], []>} : vector<8x128xf32>, vector<128x8xf32>, vector<8x8xf32> -> vector<8x8xf32>
    %18 = vector.broadcast %4 : vector<1x8xf32> to vector<8x8xf32>
    %19 = arith.addf %17, %18 : vector<8x8xf32>
    %c0_14 = arith.constant 0 : index
    %c0_15 = arith.constant 0 : index
    %20 = vector.load %arg5[%c0_14, %c0_15] : memref<8x8xf32, #tpu.memory_space<vmem>>, vector<8x8xf32>
    tpu.vector_store %arg5[%c0_14, %c0_15], %19 {strides = array<i32>} : memref<8x8xf32, #tpu.memory_space<vmem>>, vector<8x8xf32>,
    return
  }
  func.func @transform_0(%arg0: i32) -> (i32, i32) {
    %c0_i32 = arith.constant 0 : i32
    %c0_i32_0 = arith.constant 0 : i32
    return %arg0, %c0_i32 : i32, i32
  }
  func.func @transform_1(%arg0: i32) -> (i32, i32) {
    %c0_i32 = arith.constant 0 : i32
    %c0_i32_0 = arith.constant 0 : i32
    %c0_i32_1 = arith.constant 0 : i32
    return %c0_i32, %c0_i32_0 : i32, i32
  }
  func.func @transform_2(%arg0: i32) -> (i32, i32) {
    %c0_i32 = arith.constant 0 : i32
    %c0_i32_0 = arith.constant 0 : i32
    %c0_i32_1 = arith.constant 0 : i32
    return %c0_i32, %c0_i32_0 : i32, i32
  }
  func.func @transform_3(%arg0: i32) -> (i32, i32) {
    %c0_i32 = arith.constant 0 : i32
    %c0_i32_0 = arith.constant 0 : i32
    %c0_i32_1 = arith.constant 0 : i32
    return %c0_i32, %c0_i32_0 : i32, i32
  }
  func.func @transform_4(%arg0: i32) -> (i32, i32) {
    %c0_i32 = arith.constant 0 : i32
    %c0_i32_0 = arith.constant 0 : i32
    return %arg0, %c0_i32 : i32, i32
  }
}

</mosaic_0001>

<bundles_post_ra>
// kernel: dqn_forward.1
= control target key start
LH: loop header
LB: loop body
LE: loop exit
PB: predicated region body
PF: predicated region fallthrough
CT: control target
= control target key end

     0   :  { %9 = vsyncpa [#allocation3], 0  ;;  %s449_s15 = smov [#allocation2]   ;;  %s585_s0 = inlined_call_operand.vmem [shape: f32[8,16], index: 0, kind: input, shape index: {}]   ;;  %s586_s1 = inlined_call_operand.hbm [shape: f32[144,128], index: 1, kind: input, shape index: {}]   ;;  %s587_s2 = inlined_call_operand.vmem [shape: f32[128,8], index: 2, kind: input, shape index: {}]   ;;  %s588_s3 = inlined_call_operand.vmem [shape: f32[8,128], index: 3, kind: input, shape index: {}]   ;;  %s589_s4 = inlined_call_operand.vmem [shape: f32[8,8], index: 4, kind: output, shape index: {}]  }
   0x1   :  { %s17_s16 = sshll.u32 %s449_s15, 4  ;;  %s18_s16 = int_to_ptr.vmem [resolvable:$true] %s17_s16 }
   0x2   :  { %s435_s17 = scalar_lea.vmem %s18_s16, 2304  ;;  %p440_p1 = scmp.lt.s32.totalorder %s18_s16, %s18_s16 }
   0x3   :  { %p436_p0 = scmp.ne.s32.totalorder %s18_s16, %s435_s17  ;;  %p441_p2 = scmp.lt.s32.totalorder %s435_s17, %s435_s17 }
   0x5   :  { %p442_p3 = por %p441_p2, %p440_p1 }
   0x7   :  { %p443_p4 = pnand %p442_p3, %p436_p0 }
   0x9   :  { %446 = shalt.err (!%p443_p4)
}
   0xa   :  { %s450_s18 = smov 128   ;;  %s451_s19 = smov 8  }
   0xb   :  { %23 = dma.hbm_to_vmem [thread:$0]  %s586_s1, 2304, %s18_s16, [#allocation3], %s450_s18, %s450_s18, %s451_s19  }
   0xc   :  { %447 = dma.done.wait [#allocation3], 2304  }
   0xd   :  { %448 = vsyncadd [#allocation3], 4294964992  ;;  %v452_v0 = vmov 0.0   ;;  %vm453_vm0 = vmmov 0   ;;  %v32_v1 = vld [vmem:[#allocation2 + $0x8] sm:$0xff]  ;;  %v31_v2 = vld [vmem:[#allocation2] sm:$0xff] }
   0xe   :  { %345 = vmatprep.subr.mxu0 %v452_v0  ;;  %349 = vmatprep.mubr.msk.f32.mxu0 %vm453_vm0, %v452_v0  ;;  %v52_v3 = vld [vmem:[%s585_s0] sm:$0xff]  ;;  %vm57_vm1 = vcmask 130048   ;;  %v48_v4 = vld [vmem:[#allocation2 + $0x88] sm:$0xff]  ;;  %v46_v6 = vld [vmem:[#allocation2 + $0x78] sm:$0xff]  ;;  %vm297_vm2 = vcmask 64512  }
   0xf   :  { %352 = vmatprep.subr.mxu1 %v452_v0  ;;  %384 = vmatprep.mubr.msk.f32.mxu1 %vm453_vm0, %v452_v0  ;;  %v47_v5 = vld [vmem:[#allocation2 + $0x80] sm:$0xff]  ;;  %v45_v7 = vld [vmem:[#allocation2 + $0x70] sm:$0xff]  ;;  %v44_v8 = vld [vmem:[#allocation2 + $0x68] sm:$0xff] }
  0x10   :  { %346 = vmatpush3.msra.mxu0 %v32_v1  ;;  %353 = vmatpush3.msra.mxu1 %v48_v4  ;;  %v43_v9 = vld [vmem:[#allocation2 + $0x60] sm:$0xff]  ;;  %v42_v10 = vld [vmem:[#allocation2 + $0x58] sm:$0xff]  ;;  %v41_v11 = vld [vmem:[#allocation2 + $0x50] sm:$0xff] }
  0x11   :  { %347 = vmatprep.subr.mxu0 %v452_v0  ;;  %354 = vmatprep.subr.mxu1 %v452_v0  ;;  %v40_v12 = vld [vmem:[#allocation2 + $0x48] sm:$0xff]  ;;  %v39_v13 = vld [vmem:[#allocation2 + $0x40] sm:$0xff]  ;;  %v38_v14 = vld [vmem:[#allocation2 + $0x38] sm:$0xff] }
  0x12   :  { %348 = vmatpush3.msra.mxu0 %v31_v2  ;;  %355 = vmatpush3.msra.mxu1 %v47_v5  ;;  %v37_v15 = vld [vmem:[#allocation2 + $0x30] sm:$0xff]  ;;  %v36_v16 = vld [vmem:[#allocation2 + $0x28] sm:$0xff]  ;;  %v35_v17 = vld [vmem:[#allocation2 + $0x20] sm:$0xff] }
  0x13   :  { %350 = vmatmul.mubr.msk.f32.vlgmr.msra.gmra.mxu0 %vm57_vm1, %v52_v3  ;;  %356 = vmatprep.subr.mxu1 %v452_v0  ;;  %v34_v18 = vld [vmem:[#allocation2 + $0x18] sm:$0xff]  ;;  %v33_v19 = vld [vmem:[#allocation2 + $0x10] sm:$0xff]  ;;  %v220_v22 = vld [vmem:[%s587_s2 + $0x68] sm:$0xff] }
  0x14   :  { %387 = vmatprep.subr.mxu0 %v452_v0  ;;  %357 = vmatpush3.msra.mxu1 %v46_v6  ;;  %v222_v20 = vld [vmem:[%s587_s2 + $0x78] sm:$0xff]  ;;  %v221_v21 = vld [vmem:[%s587_s2 + $0x70] sm:$0xff]  ;;  %v219_v23 = vld [vmem:[%s587_s2 + $0x60] sm:$0xff] }
  0x15   :  { %419 = vmatprep.mubr.msk.f32.mxu0 %vm453_vm0, %v452_v0  ;;  %358 = vmatprep.subr.mxu1 %v452_v0  ;;  %v218_v24 = vld [vmem:[%s587_s2 + $0x58] sm:$0xff]  ;;  %v217_v25 = vld [vmem:[%s587_s2 + $0x50] sm:$0xff]  ;;  %v216_v26 = vld [vmem:[%s587_s2 + $0x48] sm:$0xff] }
  0x16   :  { %359 = vmatpush3.msra.mxu1 %v45_v7  ;;  %388 = vmatpush3.msra.mxu0 %v222_v20  ;;  %v215_v27 = vld [vmem:[%s587_s2 + $0x40] sm:$0xff]  ;;  %v214_v28 = vld [vmem:[%s587_s2 + $0x38] sm:$0xff]  ;;  %v213_v29 = vld [vmem:[%s587_s2 + $0x30] sm:$0xff] }
  0x17   :  { %360 = vmatprep.subr.mxu1 %v452_v0  ;;  %389 = vmatprep.subr.mxu0 %v452_v0  ;;  %v212_v30 = vld [vmem:[%s587_s2 + $0x28] sm:$0xff]  ;;  %v211_v31 = vld [vmem:[%s587_s2 + $0x20] sm:$0xff]  ;;  %v210_v32 = vld [vmem:[%s587_s2 + $0x18] sm:$0xff] }
  0x18   :  { %361 = vmatpush3.msra.mxu1 %v44_v8  ;;  %390 = vmatpush3.msra.mxu0 %v221_v21  ;;  %v304_v33 = vld [vmem:[%s588_s3] ss:$0 sm:$0xff]  ;;  %v209_v38 = vld [vmem:[%s587_s2 + $0x10] sm:$0xff]  ;;  %v208_v39 = vld [vmem:[%s587_s2 + $0x8] sm:$0xff] }
  0x19   :  { %362 = vmatprep.subr.mxu1 %v452_v0  ;;  %391 = vmatprep.subr.mxu0 %v452_v0  ;;  %v207_v40 = vld [vmem:[%s587_s2] sm:$0xff] }
  0x1a   :  { %363 = vmatpush3.msra.mxu1 %v43_v9  ;;  %392 = vmatpush3.msra.mxu0 %v220_v22  ;;  %v306_v41 = vld [vmem:[%s588_s3 + $0x1] ss:$0 sm:$0xff]  ;;  %v307_v46 = vld [vmem:[%s588_s3 + $0x2] ss:$0 sm:$0xff] }
  0x1b   :  { %364 = vmatprep.subr.mxu1 %v452_v0  ;;  %393 = vmatprep.subr.mxu0 %v452_v0 }
  0x1c   :  { %365 = vmatpush3.msra.mxu1 %v42_v10  ;;  %394 = vmatpush3.msra.mxu0 %v219_v23 }
  0x1d   :  { %366 = vmatprep.subr.mxu1 %v452_v0  ;;  %395 = vmatprep.subr.mxu0 %v452_v0 }
  0x1e   :  { %367 = vmatpush3.msra.mxu1 %v41_v11  ;;  %396 = vmatpush3.msra.mxu0 %v218_v24 }
  0x1f   :  { %368 = vmatprep.subr.mxu1 %v452_v0  ;;  %397 = vmatprep.subr.mxu0 %v452_v0 }
  0x20   :  { %369 = vmatpush3.msra.mxu1 %v40_v12  ;;  %398 = vmatpush3.msra.mxu0 %v217_v25 }
  0x21   :  { %370 = vmatprep.subr.mxu1 %v452_v0  ;;  %399 = vmatprep.subr.mxu0 %v452_v0 }
  0x22   :  { %371 = vmatpush3.msra.mxu1 %v39_v13  ;;  %400 = vmatpush3.msra.mxu0 %v216_v26 }
  0x23   :  { %372 = vmatprep.subr.mxu1 %v452_v0  ;;  %401 = vmatprep.subr.mxu0 %v452_v0 }
  0x24   :  { %373 = vmatpush3.msra.mxu1 %v38_v14  ;;  %402 = vmatpush3.msra.mxu0 %v215_v27 }
  0x25   :  { %374 = vmatprep.subr.mxu1 %v452_v0  ;;  %403 = vmatprep.subr.mxu0 %v452_v0 }
  0x26   :  { %375 = vmatpush3.msra.mxu1 %v37_v15  ;;  %404 = vmatpush3.msra.mxu0 %v214_v28 }
  0x27   :  { %376 = vmatprep.subr.mxu1 %v452_v0  ;;  %405 = vmatprep.subr.mxu0 %v452_v0 }
  0x28   :  { %377 = vmatpush3.msra.mxu1 %v36_v16  ;;  %406 = vmatpush3.msra.mxu0 %v213_v29 }
  0x29   :  { %378 = vmatprep.subr.mxu1 %v452_v0  ;;  %407 = vmatprep.subr.mxu0 %v452_v0 }
  0x2a   :  { %379 = vmatpush3.msra.mxu1 %v35_v17  ;;  %408 = vmatpush3.msra.mxu0 %v212_v30 }
  0x2b   :  { %380 = vmatprep.subr.mxu1 %v452_v0  ;;  %409 = vmatprep.subr.mxu0 %v452_v0 }
  0x2c   :  { %381 = vmatpush3.msra.mxu1 %v34_v18  ;;  %410 = vmatpush3.msra.mxu0 %v211_v31 }
  0x2d   :  { %382 = vmatprep.subr.mxu1 %v452_v0  ;;  %411 = vmatprep.subr.mxu0 %v452_v0 }
  0x2e   :  { %383 = vmatpush3.msra.mxu1 %v33_v19  ;;  %412 = vmatpush3.msra.mxu0 %v210_v32 }
  0x2f   :  { %413 = vmatprep.subr.mxu0 %v452_v0 }
  0x30   :  { %414 = vmatpush3.msra.mxu0 %v209_v38 }
  0x31   :  { %415 = vmatprep.subr.mxu0 %v452_v0 }
  0x32   :  { %416 = vmatpush3.msra.mxu0 %v208_v39 }
  0x33   :  { %417 = vmatprep.subr.mxu0 %v452_v0 }
  0x34   :  { %418 = vmatpush3.msra.mxu0 %v207_v40 }
  0xd3   :  { %v127_v34 = vpop.f32.mrf.mxu0 }
  0xd4   :  { %v128_v35 = vadd.f32 %v304_v33, %v127_v34 }
  0xd5   :  { %v351_v36 = vpop.f32.mrf.mxu0 }
  0xd6   :  { %v131_v37 = vmax.f32 %v128_v35, 0.0 }
  0xd8   :  { %385 = vmatmul.mubr.f32.vlgmr.msra.gmra.mxu1 %v131_v37 }
 0x198   :  { %v202_v42 = vpop.f32.mrf.mxu1 }
 0x199   :  { %v203_v43 = vadd.f32 %v306_v41, %v202_v42 }
 0x19a   :  { %v386_v44 = vpop.f32.mrf.mxu1 }
 0x19b   :  { %v206_v45 = vmax.f32 %v203_v43, 0.0 }
 0x19d   :  { %420 = vmatmul.mubr.f32.vlgmr.msra.gmra.mxu0 %v206_v45 }
 0x25d   :  { %v293_v47 = vpop.f32.mrf.mxu0 }
 0x25e   :  { %v294_v48 = vadd.f32 %v307_v46, %v293_v47 }
 0x25f   :  { %v421_v49 = vpop.f32.mrf.mxu0 }
 0x260   :  { %298 = vst.msk [vmem:[%s589_s4] sm:$0xff] %vm297_vm2, %v294_v48 }
 0x261   :  { %303 = vsyncpa [#allocation3], 1 }

</bundles_post_ra>
